<compile_context>
chip_gen: v7x
topology: tpu7x:2x2x1
jax: 0.10.0
libtpu: 0.0.40
codegen_flags: <defaults>
</compile_context>

<pallas_src>
import jax
import jax.numpy as jnp
import numpy as np
from jax import lax
from jax.experimental import pallas as pl
from jax.experimental.pallas import tpu as pltpu


def _make_kernel(K, C_in, C_out, stride, W1, W2):
    def kernel(x_ref, mask_ref, w1_ref, b1_ref, w2_ref, b2_ref, out_ref,
               xcol_ref, ycol_ref):
        # ---- conv_layer: in-kernel im2col (K whole-width lane slices, K wide
        #      stores) + ONE MXU matmul with f32 accumulation.
        x = x_ref[...]                                              # (C_in, W0)
        for k in range(K):                                          # static unroll
            xcol_ref[k * C_in:(k + 1) * C_in, :] = (
                x[:, k: k + (W1 - 1) * stride + 1: stride])         # (C_in, W1)
        y = jnp.dot(w1_ref[...], xcol_ref[...],
                    preferred_element_type=jnp.float32)             # (C_out, W1) f32
        # bias + conv_layer2 zero-padding in one whole-width masked multiply
        # (mask = 1 on the L_out1 valid lanes of every per-sample period).
        y = (y + b1_ref[...]) * mask_ref[...]

        # TODO(synk): nn.Dropout(p=0.3) is identity in eval mode; training-mode
        # stochastic masking/scaling is not reproduced here.  (nn.ReLU is
        # defined in the module but never applied in forward.)

        y = y.astype(ycol_ref.dtype)                                # single cast (no-op for f32)

        # ---- conv_layer2: same im2col trick, then bias + channel max.
        for k in range(K):                                          # static unroll
            ycol_ref[k * C_out:(k + 1) * C_out, :] = (
                y[:, k: k + (W2 - 1) * stride + 1: stride])         # (C_out, W2)
        z = jnp.dot(w2_ref[...], ycol_ref[...],
                    preferred_element_type=jnp.float32) + b2_ref[...]   # (C_out, W2) f32

        # torch.max(x, dim=1, keepdim=True).values.squeeze(1)
        out_ref[...] = jnp.max(z, axis=0, keepdims=True)            # (1, W2)

    return kernel


def simple_cnn_forward(x, params, *, kernel_size, stride, padding,
                       compute_dtype=jnp.float32):
    """x: (N, C_in, L) float32. Returns (N, L_out2) float32 (eval-mode forward).

    compute_dtype controls the MXU operand dtype (bf16 worthwhile on v6e/v7x
    only); accumulation and all elementwise math stay f32.
    """
    w1, b1, w2, b2 = params["w1"], params["b1"], params["w2"], params["b2"]
    N, C_in, L = x.shape
    C_out = w1.shape[0]
    K, s, p = kernel_size, stride, padding

    L_pad1 = L + 2 * p
    L_out1 = (L_pad1 - K) // s + 1
    M = L_out1 + 2 * p                       # padded conv_layer2 input length
    L_out2 = (M - K) // s + 1

    # Per-sample lane periods.  P0/P1/P2 are exact stride multiples so each
    # conv layer reduces to K whole-width (strided) lane slices in the kernel.
    P2 = max(L_out2, -(-M // s), -(-L_pad1 // (s * s)))
    P1 = P2 * s
    P0 = P1 * s

    # Batch blocking: lane-dense blocks (~1024 lanes of matmul RHS / output per
    # grid step); a small batch is never split across steps (grid=(1,)) since
    # per-step overhead beats any 2-TensorCore split below ~128 lanes.
    n_blk = max(1, min(N, 1024 // P2))
    num_blocks = -(-N // n_blk)
    N_pad = num_blocks * n_blk

    W2 = n_blk * P2                                      # output / ycol lane width
    W1 = n_blk * P1 + max(0, K - s)                      # xcol / y lane width
    A = p * s                                            # left guard of the input slab
    W0 = max(A + n_blk * P0, (W1 - 1) * s + K)           # input slab lane width

    # ---- wrapper layout plumbing only (no FLOPs, no K-fold expansion):
    # padded sample i sits at lane offset A + i*P0 of its block's slab.
    x_p = jnp.pad(x.astype(compute_dtype),
                  ((0, N_pad - N), (0, 0), (p, P0 - L - p)))         # (N_pad, C_in, P0)
    x_b = (x_p.reshape(num_blocks, n_blk, C_in, P0)
              .transpose(0, 2, 1, 3)
              .reshape(num_blocks, C_in, n_blk * P0))
    X = jnp.pad(x_b, ((0, 0), (0, 0), (A, W0 - A - n_blk * P0)))     # (num_blocks, C_in, W0)

    # 0/1 mask selecting the L_out1 valid lanes of each per-sample period of y.
    mask_np = np.zeros((1, W1), np.float32)
    for i in range(n_blk):
        mask_np[0, i * P1 + p: i * P1 + p + L_out1] = 1.0
    mask = jnp.asarray(mask_np)

    # w[co, ci, k] -> wf[co, k*C + ci]  (matches the in-kernel im2col row order)
    w1f = jnp.transpose(w1, (0, 2, 1)).reshape(C_out, K * C_in).astype(compute_dtype)
    w2f = jnp.transpose(w2, (0, 2, 1)).reshape(C_out, K * C_out).astype(compute_dtype)
    b1c = b1.reshape(C_out, 1).astype(jnp.float32)
    b2c = b2.reshape(C_out, 1).astype(jnp.float32)

    kernel = _make_kernel(K, C_in, C_out, s, W1, W2)

    out = pl.pallas_call(
        kernel,
        out_shape=jax.ShapeDtypeStruct((num_blocks, 1, W2), jnp.float32),
        grid=(num_blocks,),
        in_specs=[
            pl.BlockSpec((pl.Squeezed(), C_in, W0), lambda i: (i, 0, 0)),
            pl.BlockSpec((1, W1), lambda i: (0, 0)),             # mask, VMEM resident
            pl.BlockSpec((C_out, K * C_in), lambda i: (0, 0)),   # weights, VMEM resident
            pl.BlockSpec((C_out, 1), lambda i: (0, 0)),
            pl.BlockSpec((C_out, K * C_out), lambda i: (0, 0)),
            pl.BlockSpec((C_out, 1), lambda i: (0, 0)),
        ],
        out_specs=pl.BlockSpec((pl.Squeezed(), 1, W2), lambda i: (i, 0, 0)),
        scratch_shapes=[
            pltpu.VMEM((K * C_in, W1), compute_dtype),    # layer-1 im2col
            pltpu.VMEM((K * C_out, W2), compute_dtype),   # layer-2 im2col
        ],
        compiler_params=pltpu.CompilerParams(
            # Only splits across v7x cores when num_blocks > 1, i.e. when each
            # block is already lane-dense (>= ~1024 lanes by construction).
            dimension_semantics=("parallel",),
            vmem_limit_bytes=32 * 1024 * 1024,   # generation-safe; footprint is KiB-scale
        ),
    )(X, mask, w1f, b1c, w2f, b2c)

    return out.reshape(N_pad, P2)[:N, :L_out2]


def reference_forward(x, params, *, kernel_size, stride, padding):
    """Pure-JAX reference (eval-mode dropout = identity)."""
    w1, b1, w2, b2 = params["w1"], params["b1"], params["w2"], params["b2"]
    dn = lax.conv_dimension_numbers(x.shape, w1.shape, ("NCH", "OIH", "NCH"))
    y = lax.conv_general_dilated(x, w1, (stride,), [(padding, padding)],
                                 dimension_numbers=dn) + b1[None, :, None]
    z = lax.conv_general_dilated(y, w2, (stride,), [(padding, padding)],
                                 dimension_numbers=dn) + b2[None, :, None]
    return jnp.max(z, axis=1)


if __name__ == "__main__":
    # Small shapes consistent with the module's Conv1d usage.
    N, C_in, C_out, L = 2, 4, 8, 16
    K, stride, padding = 3, 1, 1

    key = jax.random.PRNGKey(0)
    k1, k2, k3, k4, kx, kx2 = jax.random.split(key, 6)
    # Deterministic init mimicking PyTorch's Conv1d default U(-1/sqrt(fan_in), +)
    bound1 = 1.0 / np.sqrt(C_in * K)
    bound2 = 1.0 / np.sqrt(C_out * K)
    params = {
        "w1": jax.random.uniform(k1, (C_out, C_in, K), jnp.float32, -bound1, bound1),
        "b1": jax.random.uniform(k2, (C_out,), jnp.float32, -bound1, bound1),
        "w2": jax.random.uniform(k3, (C_out, C_out, K), jnp.float32, -bound2, bound2),
        "b2": jax.random.uniform(k4, (C_out,), jnp.float32, -bound2, bound2),
    }
    x = jax.random.normal(kx, (N, C_in, L), jnp.float32)

    ref = jax.block_until_ready(
        reference_forward(x, params, kernel_size=K, stride=stride, padding=padding))

    # f32 MXU-operand path (default; recommended on v5e) -- exact vs reference.
    out = jax.block_until_ready(
        simple_cnn_forward(x, params, kernel_size=K, stride=stride, padding=padding))
    assert out.shape == ref.shape, (out.shape, ref.shape)
    np.testing.assert_allclose(np.asarray(out), np.asarray(ref), rtol=1e-5, atol=1e-5)

    # bf16 MXU-operand path (worth it on v6e/v7x), f32 accumulate -> looser tolerance.
    out_bf16 = jax.block_until_ready(
        simple_cnn_forward(x, params, kernel_size=K, stride=stride, padding=padding,
                           compute_dtype=jnp.bfloat16))
    assert out_bf16.shape == ref.shape, (out_bf16.shape, ref.shape)
    np.testing.assert_allclose(np.asarray(out_bf16), np.asarray(ref), rtol=5e-2, atol=5e-2)

    # stride=2 config exercises the strided (de-interleave) slice path.
    x2 = jax.random.normal(kx2, (3, C_in, L), jnp.float32)
    ref2 = jax.block_until_ready(
        reference_forward(x2, params, kernel_size=K, stride=2, padding=padding))
    out2 = jax.block_until_ready(
        simple_cnn_forward(x2, params, kernel_size=K, stride=2, padding=padding))
    assert out2.shape == ref2.shape, (out2.shape, ref2.shape)
    np.testing.assert_allclose(np.asarray(out2), np.asarray(ref2), rtol=1e-5, atol=1e-5)

    print("KERNEL_OK")
</pallas_src>

<mosaic_0001>
module attributes {stable_mosaic.version = 11 : i64} {
  func.func @kernel(%arg0: i32, %arg1: memref<1x4x40xf32, #tpu.memory_space<vmem>>, %arg2: memref<1x38xf32, #tpu.memory_space<vmem>>, %arg3: memref<8x12xf32, #tpu.memory_space<vmem>>, %arg4: memref<8x1xf32, #tpu.memory_space<vmem>>, %arg5: memref<8x24xf32, #tpu.memory_space<vmem>>, %arg6: memref<8x1xf32, #tpu.memory_space<vmem>>, %arg7: memref<1x1x36xf32, #tpu.memory_space<vmem>>, %arg8: memref<12x38xf32, #tpu.memory_space<vmem>>, %arg9: memref<24x36xf32, #tpu.memory_space<vmem>>) attributes {dimension_semantics = [#tpu.dimension_semantics<parallel>], iteration_bounds = array<i64: 1>, scalar_prefetch = 0 : i64, scratch_operands = 2 : i64, tpu.core_type = #tpu.core_type<tc>, window_params = [{transform_indices = @transform_0, window_bounds = array<i64: 1, 4, 40>}, {pipeline_mode = #tpu.pipeline_mode<synchronous>, transform_indices = @transform_1, window_bounds = array<i64: 1, 38>}, {pipeline_mode = #tpu.pipeline_mode<synchronous>, transform_indices = @transform_2, window_bounds = array<i64: 8, 12>}, {pipeline_mode = #tpu.pipeline_mode<synchronous>, transform_indices = @transform_3, window_bounds = array<i64: 8, 1>}, {pipeline_mode = #tpu.pipeline_mode<synchronous>, transform_indices = @transform_4, window_bounds = array<i64: 8, 24>}, {pipeline_mode = #tpu.pipeline_mode<synchronous>, transform_indices = @transform_5, window_bounds = array<i64: 8, 1>}, {transform_indices = @transform_6, window_bounds = array<i64: 1, 1, 36>}]} {
    %c0 = arith.constant 0 : index
    %c0_0 = arith.constant 0 : index
    %c0_1 = arith.constant 0 : index
    %0 = vector.load %arg1[%c0, %c0_0, %c0_1] : memref<1x4x40xf32, #tpu.memory_space<vmem>>, vector<1x4x40xf32>
    %1 = vector.shape_cast %0 : vector<1x4x40xf32> to vector<4x40xf32>
    %2 = vector.extract_strided_slice %1 {offsets = [0, 0], sizes = [4, 38], strides = [1, 1]} : vector<4x40xf32> to vector<4x38xf32>
    %c0_2 = arith.constant 0 : index
    %c0_3 = arith.constant 0 : index
    %3 = vector.load %arg8[%c0_2, %c0_3] : memref<12x38xf32, #tpu.memory_space<vmem>>, vector<4x38xf32>
    tpu.vector_store %arg8[%c0_2, %c0_3], %2 {strides = array<i32>} : memref<12x38xf32, #tpu.memory_space<vmem>>, vector<4x38xf32>,
    %4 = vector.extract_strided_slice %1 {offsets = [0, 1], sizes = [4, 38], strides = [1, 1]} : vector<4x40xf32> to vector<4x38xf32>
    %c4 = arith.constant 4 : index
    %c0_4 = arith.constant 0 : index
    %5 = vector.load %arg8[%c4, %c0_4] : memref<12x38xf32, #tpu.memory_space<vmem>>, vector<4x38xf32>
    tpu.vector_store %arg8[%c4, %c0_4], %4 {strides = array<i32>} : memref<12x38xf32, #tpu.memory_space<vmem>>, vector<4x38xf32>,
    %6 = vector.extract_strided_slice %1 {offsets = [0, 2], sizes = [4, 38], strides = [1, 1]} : vector<4x40xf32> to vector<4x38xf32>
    %c8 = arith.constant 8 : index
    %c0_5 = arith.constant 0 : index
    %7 = vector.load %arg8[%c8, %c0_5] : memref<12x38xf32, #tpu.memory_space<vmem>>, vector<4x38xf32>
    tpu.vector_store %arg8[%c8, %c0_5], %6 {strides = array<i32>} : memref<12x38xf32, #tpu.memory_space<vmem>>, vector<4x38xf32>,
    %c0_6 = arith.constant 0 : index
    %c0_7 = arith.constant 0 : index
    %8 = vector.load %arg3[%c0_6, %c0_7] : memref<8x12xf32, #tpu.memory_space<vmem>>, vector<8x12xf32>
    %c0_8 = arith.constant 0 : index
    %c0_9 = arith.constant 0 : index
    %9 = vector.load %arg8[%c0_8, %c0_9] : memref<12x38xf32, #tpu.memory_space<vmem>>, vector<12x38xf32>
    %cst = arith.constant dense<0.000000e+00> : vector<8x38xf32>
    %10 = tpu.matmul %8, %9, %cst {dimension_numbers = #tpu.dot_dimension_numbers<[1], [0], [0], [1], [0, 0, 1, 1], [], []>} : vector<8x12xf32>, vector<12x38xf32>, vector<8x38xf32> -> vector<8x38xf32>
    %c0_10 = arith.constant 0 : index
    %c0_11 = arith.constant 0 : index
    %11 = vector.load %arg4[%c0_10, %c0_11] : memref<8x1xf32, #tpu.memory_space<vmem>>, vector<8x1xf32>
    %12 = vector.broadcast %11 : vector<8x1xf32> to vector<8x38xf32>
    %13 = arith.addf %10, %12 : vector<8x38xf32>
    %c0_12 = arith.constant 0 : index
    %c0_13 = arith.constant 0 : index
    %14 = vector.load %arg2[%c0_12, %c0_13] : memref<1x38xf32, #tpu.memory_space<vmem>>, vector<1x38xf32>
    %15 = vector.broadcast %14 : vector<1x38xf32> to vector<8x38xf32>
    %16 = arith.mulf %13, %15 : vector<8x38xf32>
    %17 = vector.extract_strided_slice %16 {offsets = [0, 0], sizes = [8, 36], strides = [1, 1]} : vector<8x38xf32> to vector<8x36xf32>
    %c0_14 = arith.constant 0 : index
    %c0_15 = arith.constant 0 : index
    %18 = vector.load %arg9[%c0_14, %c0_15] : memref<24x36xf32, #tpu.memory_space<vmem>>, vector<8x36xf32>
    tpu.vector_store %arg9[%c0_14, %c0_15], %17 {strides = array<i32>} : memref<24x36xf32, #tpu.memory_space<vmem>>, vector<8x36xf32>,
    %19 = vector.extract_strided_slice %16 {offsets = [0, 1], sizes = [8, 36], strides = [1, 1]} : vector<8x38xf32> to vector<8x36xf32>
    %c8_16 = arith.constant 8 : index
    %c0_17 = arith.constant 0 : index
    %20 = vector.load %arg9[%c8_16, %c0_17] : memref<24x36xf32, #tpu.memory_space<vmem>>, vector<8x36xf32>
    tpu.vector_store %arg9[%c8_16, %c0_17], %19 {strides = array<i32>} : memref<24x36xf32, #tpu.memory_space<vmem>>, vector<8x36xf32>,
    %21 = vector.extract_strided_slice %16 {offsets = [0, 2], sizes = [8, 36], strides = [1, 1]} : vector<8x38xf32> to vector<8x36xf32>
    %c16 = arith.constant 16 : index
    %c0_18 = arith.constant 0 : index
    %22 = vector.load %arg9[%c16, %c0_18] : memref<24x36xf32, #tpu.memory_space<vmem>>, vector<8x36xf32>
    tpu.vector_store %arg9[%c16, %c0_18], %21 {strides = array<i32>} : memref<24x36xf32, #tpu.memory_space<vmem>>, vector<8x36xf32>,
    %c0_19 = arith.constant 0 : index
    %c0_20 = arith.constant 0 : index
    %23 = vector.load %arg5[%c0_19, %c0_20] : memref<8x24xf32, #tpu.memory_space<vmem>>, vector<8x24xf32>
    %c0_21 = arith.constant 0 : index
    %c0_22 = arith.constant 0 : index
    %24 = vector.load %arg9[%c0_21, %c0_22] : memref<24x36xf32, #tpu.memory_space<vmem>>, vector<24x36xf32>
    %cst_23 = arith.constant dense<0.000000e+00> : vector<8x36xf32>
    %25 = tpu.matmul %23, %24, %cst_23 {dimension_numbers = #tpu.dot_dimension_numbers<[1], [0], [0], [1], [0, 0, 1, 1], [], []>} : vector<8x24xf32>, vector<24x36xf32>, vector<8x36xf32> -> vector<8x36xf32>
    %c0_24 = arith.constant 0 : index
    %c0_25 = arith.constant 0 : index
    %26 = vector.load %arg6[%c0_24, %c0_25] : memref<8x1xf32, #tpu.memory_space<vmem>>, vector<8x1xf32>
    %27 = vector.broadcast %26 : vector<8x1xf32> to vector<8x36xf32>
    %28 = arith.addf %25, %27 : vector<8x36xf32>
    %cst_26 = arith.constant dense<0xFF800000> : vector<36xf32>
    %29 = vector.multi_reduction <maximumf>, %28, %cst_26 [0] : vector<8x36xf32> to vector<36xf32>
    %30 = vector.shape_cast %29 : vector<36xf32> to vector<1x36xf32>
    %c0_27 = arith.constant 0 : index
    %c0_28 = arith.constant 0 : index
    %c0_29 = arith.constant 0 : index
    %31 = vector.load %arg7[%c0_27, %c0_28, %c0_29] : memref<1x1x36xf32, #tpu.memory_space<vmem>>, vector<1x1x36xf32>
    %32 = vector.shape_cast %31 : vector<1x1x36xf32> to vector<1x36xf32>
    %33 = vector.shape_cast %30 : vector<1x36xf32> to vector<1x1x36xf32>
    tpu.vector_store %arg7[%c0_27, %c0_28, %c0_29], %33 {strides = array<i32>} : memref<1x1x36xf32, #tpu.memory_space<vmem>>, vector<1x1x36xf32>,
    return
  }
  func.func @transform_0(%arg0: i32) -> (i32, i32, i32) {
    %c0_i32 = arith.constant 0 : i32
    %c0_i32_0 = arith.constant 0 : i32
    %c0_i32_1 = arith.constant 0 : i32
    return %arg0, %c0_i32, %c0_i32_0 : i32, i32, i32
  }
  func.func @transform_1(%arg0: i32) -> (i32, i32) {
    %c0_i32 = arith.constant 0 : i32
    %c0_i32_0 = arith.constant 0 : i32
    %c0_i32_1 = arith.constant 0 : i32
    return %c0_i32, %c0_i32_0 : i32, i32
  }
  func.func @transform_2(%arg0: i32) -> (i32, i32) {
    %c0_i32 = arith.constant 0 : i32
    %c0_i32_0 = arith.constant 0 : i32
    %c0_i32_1 = arith.constant 0 : i32
    return %c0_i32, %c0_i32_0 : i32, i32
  }
  func.func @transform_3(%arg0: i32) -> (i32, i32) {
    %c0_i32 = arith.constant 0 : i32
    %c0_i32_0 = arith.constant 0 : i32
    %c0_i32_1 = arith.constant 0 : i32
    return %c0_i32, %c0_i32_0 : i32, i32
  }
  func.func @transform_4(%arg0: i32) -> (i32, i32) {
    %c0_i32 = arith.constant 0 : i32
    %c0_i32_0 = arith.constant 0 : i32
    %c0_i32_1 = arith.constant 0 : i32
    return %c0_i32, %c0_i32_0 : i32, i32
  }
  func.func @transform_5(%arg0: i32) -> (i32, i32) {
    %c0_i32 = arith.constant 0 : i32
    %c0_i32_0 = arith.constant 0 : i32
    %c0_i32_1 = arith.constant 0 : i32
    return %c0_i32, %c0_i32_0 : i32, i32
  }
  func.func @transform_6(%arg0: i32) -> (i32, i32, i32) {
    %c0_i32 = arith.constant 0 : i32
    %c0_i32_0 = arith.constant 0 : i32
    %c0_i32_1 = arith.constant 0 : i32
    return %arg0, %c0_i32, %c0_i32_0 : i32, i32, i32
  }
}

</mosaic_0001>

<bundles_post_ra>
// kernel: tpu_custom_call.1
= control target key start
LH: loop header
LB: loop body
LE: loop exit
PB: predicated region body
PF: predicated region fallthrough
CT: control target
= control target key end

     0   :  { %11 = vsyncpa [#allocation5], 0  ;;  %s447_s0 = inlined_call_operand.hbm [shape: f32[1,4,40], index: 0, kind: input, shape index: {}]   ;;  %s448_s1 = inlined_call_operand.vmem [shape: f32[1,38], index: 1, kind: input, shape index: {}]   ;;  %s449_s2 = inlined_call_operand.vmem [shape: f32[8,12], index: 2, kind: input, shape index: {}]   ;;  %s450_s3 = inlined_call_operand.vmem [shape: f32[8,1], index: 3, kind: input, shape index: {}]   ;;  %s451_s4 = inlined_call_operand.vmem [shape: f32[8,24], index: 4, kind: input, shape index: {}]   ;;  %s452_s5 = inlined_call_operand.vmem [shape: f32[8,1], index: 5, kind: input, shape index: {}]   ;;  %s453_s6 = inlined_call_operand.hbm [shape: f32[1,1,36], index: 6, kind: output, shape index: {}]  }
   0x1   :  { %12 = vsyncpa [#allocation6], 0  ;;  %s355_s21 = smov [#allocation4]   ;;  %s307_s25 = scalar_lea.hbm %s447_s0, 64 }
   0x2   :  { %s19_s22 = sshll.u32 %s355_s21, 4  ;;  %p308_p0 = scmp.ne.s32.totalorder %s447_s0, %s307_s25  ;;  %s20_s22 = int_to_ptr.vmem [resolvable:$true] %s19_s22 }
   0x3   :  { %p311_p1 = scmp.lt.u32.totalorder %s307_s25, %s447_s0 }
   0x5   :  { %p313_p2 = pnand %p311_p1, %p308_p0 }
   0x7   :  { %316 = shalt.err (!%p313_p2)
}
   0x8   :  { %s317_s30 = scalar_lea.vmem %s20_s22, 64  ;;  %p322_p4 = scmp.lt.s32.totalorder %s20_s22, %s20_s22 }
   0x9   :  { %p318_p3 = scmp.ne.s32.totalorder %s20_s22, %s317_s30  ;;  %p323_p5 = scmp.lt.s32.totalorder %s317_s30, %s317_s30 }
   0xb   :  { %p324_p6 = por %p323_p5, %p322_p4 }
   0xd   :  { %p325_p7 = pnand %p324_p6, %p318_p3 }
   0xf   :  { %328 = shalt.err (!%p325_p7)
}
  0x10   :  { %22 = dma.hbm_to_vmem [thread:$0]  %s447_s0, 64, %s20_s22, [#allocation5]  }
  0x11   :  { %351 = dma.done.wait [#allocation5], 64  }
  0x12   :  { %352 = vsyncadd [#allocation5], 4294967232  ;;  %v356_v0 = vmov 0.0|0.0   ;;  %vm37_vm0 = vcmask 306176   ;;  %v36_v1 = vld [vmem:[#allocation4] sm:$0xf] }
  0x13   :  { %289 = vmatprep.subr.bf16.mxu0 %v356_v0  ;;  %293 = vmatprep.subr.bf16.mxu1 %v356_v0  ;;  %s357_s9 = smov 127   ;;  %38 = vst.msk [vmem:[#allocation2] sm:$0xf] %vm37_vm0, %v36_v1  ;;  %vm358_vm1 = vmmov 0   ;;  %v359_v2 = vmov 0.0   ;;  %s360_s10 = smov 126  }
  0x14   :  { %40 = vrot.lane.b32.xlu0 %v36_v1, %s357_s9  ;;  %277 = vmatprep.mubr.msk.f32.mxu0 %vm358_vm1, %v359_v2  ;;  %v51_v3 = vld [vmem:[%s450_s3] sm:$0xff]  ;;  %v361_v4 = vmov 0   ;;  %vm61_vm2 = vcmask 1043456   ;;  %vm362_vm3 = vmmov 1   ;;  %vm57_vm5 = vcmask 97280  }
  0x15   :  { %286 = vmatprep.mubr.msk.f32.mxu1 %vm358_vm1, %v359_v2  ;;  %305 = vset.pattern.permute.xlu1 %v361_v4  ;;  %vm291_vm4 = vmpackc.low %vm61_vm2, %vm362_vm3  ;;  %v48_v10 = vld [vmem:[%s449_s2] sm:$0xff]  ;;  %vm143_vm6 = vcmask 293888   ;;  %vm164_vm7 = vcmask 195584   ;;  %vm245_vm8 = vcmask 286720  }
  0x16   :  { %306 = vset.pattern.permute.xlu0 %v361_v4  ;;  %54 = vperm.xlu1 %305, %v51_v3   ;;  %v264_v13 = vld [vmem:[%s448_s1] ss:$0 sm:$0xff] }
  0x17   :  { %v158_v17 = vld [vmem:[%s452_s5] sm:$0xff]  ;;  %s363_s5 = smov [#allocation7]  }
  0x18   :  { %44 = vrot.lane.b32.xlu0 %v36_v1, %s360_s10  ;;  %v154_v23 = vld [vmem:[%s451_s4] sm:$0xff]  ;;  %s253_s17 = sshll.u32 %s363_s5, 4  ;;  %s254_s17 = int_to_ptr.vmem [resolvable:$true] %s253_s17 }
  0x19   :  { %s329_s4 = scalar_lea.vmem %s254_s17, 16  ;;  %s333_s18 = scalar_lea.vmem %s254_s17, 32 }
  0x1a   :  { %p330_p8 = scmp.ne.s32.totalorder %s254_s17, %s329_s4  ;;  %p334_p9 = scmp.lt.s32.totalorder %s254_s17, %s254_s17 }
  0x1b   :  { %p335_p10 = scmp.lt.s32.totalorder %s333_s18, %s329_s4 }
  0x1d   :  { %p336_p11 = por %p335_p10, %p334_p9 }
  0x1f   :  { %p337_p12 = pnand %p336_p11, %p330_p8 }
  0x86   :  { %v41_v5 = vpop.permute.xlu0 %40 }
  0x87   :  { %43 = vst.msk [vmem:[#allocation2 + $0x4] sm:$0xf] %vm37_vm0, %v41_v5 }
  0x8a   :  { %v45_v6 = vpop.permute.xlu0 %44 }
  0x8b   :  { %47 = vst.msk [vmem:[#allocation2 + $0x8] sm:$0xf] %vm37_vm0, %v45_v6 }
  0x8e   :  { %v49_v7 = vld [vmem:[#allocation2] sm:$0xff] }
  0x92   :  { %v50_v8 = vld [vmem:[#allocation2 + $0x8] sm:$0xf] }
  0x93   :  { %v290_v9 = vpack.c.bf16 %v50_v8, %v49_v7 }
  0x95   :  { %292 = vmatpush3.bf16.msk.msra.mxu0 %vm291_vm4, %v290_v9  ;;  %v55_v11 = vpop.permute.xlu1 %54 }
  0x98   :  { %278 = vmatmul.mubr.msk.f32.vlgmr.msra.gmra.mrb[0].mxu0 %vm57_vm5, %v48_v10 }
 0x16b   :  { %v131_v12 = vpop.f32.mrb[0].mxu0 }
 0x16c   :  { %v132_v14 = vadd.f32 %v131_v12, %v55_v11  ;;  %v279_v15 = vpop.f32.mrb[1].mxu0 }
 0x16e   :  { %v142_v16 = vmul.f32 %v264_v13, %v132_v14 }
 0x170   :  { %150 = vrot.lane.b32.xlu0 %v142_v16, %s360_s10  ;;  %146 = vrot.lane.b32.xlu1 %v142_v16, %s357_s9  ;;  %144 = vst.msk [vmem:[#allocation3] sm:$0xff] %vm143_vm6, %v142_v16 }
 0x174   :  { %161 = vperm.xlu1 %305, %v158_v17  }
 0x177   :  { %v155_v20 = vld [vmem:[#allocation3] sm:$0xff] }
 0x1e2   :  { %v151_v18 = vpop.permute.xlu0 %150  ;;  %v147_v19 = vpop.permute.xlu1 %146 }
 0x1e3   :  { %153 = vst.msk [vmem:[#allocation3 + $0x10] sm:$0xff] %vm143_vm6, %v151_v18  ;;  %149 = vst.msk [vmem:[#allocation3 + $0x8] sm:$0xff] %vm143_vm6, %v147_v19 }
 0x1ea   :  { %v156_v21 = vld [vmem:[#allocation3 + $0x8] sm:$0xff]  ;;  %v157_v24 = vld [vmem:[#allocation3 + $0x10] sm:$0xff] }
 0x1eb   :  { %v294_v22 = vpack.c.bf16 %v156_v21, %v155_v20 }
 0x1ed   :  { %295 = vmatpush3.bf16.msra.mxu1 %v294_v22 }
 0x1ee   :  { %284 = vmatprep.subr.mxu1 %v359_v2 }
 0x1f1   :  { %285 = vmatpush3.msra.mxu1 %v157_v24 }
 0x1f2   :  { %287 = vmatmul.mubr.msk.f32.vlgmr.msra.gmra.mrb[0].mxu1 %vm164_vm7, %v154_v23 }
 0x1f3   :  { %v162_v25 = vpop.permute.xlu1 %161 }
 0x2c5   :  { %v234_v26 = vpop.f32.mrb[0].mxu1 }
 0x2c6   :  { %v235_v27 = vadd.f32 %v234_v26, %v162_v25  ;;  %v288_v28 = vpop.f32.mrb[1].mxu1 }
 0x2c8   :  { %v238_v29 = vsel %vm143_vm6, %v235_v27, -inf }
 0x2c9   :  { %v239_v30 = vrot.slane %v238_v29, 4 }
 0x2cb   :  { %v240_v31 = vmax.f32 %v238_v29, %v239_v30 }
 0x2cd   :  { %v241_v32 = vrot.slane %v240_v31, 2 }
 0x2cf   :  { %v242_v33 = vmax.f32 %v240_v31, %v241_v32 }
 0x2d1   :  { %v243_v34 = vrot.slane %v242_v33, 1 }
 0x2d3   :  { %v244_v35 = vmax.f32 %v242_v33, %v243_v34 }
 0x2d5   :  { %246 = vst.msk [vmem:[#allocation7] sm:$0x1] %vm245_vm8, %v244_v35 }
 0x2d6   :  { %340 = shalt.err (!%p337_p12)
}
 0x2d7   :  { %s341_s21 = scalar_lea.hbm %s453_s6, 16 }
 0x2d8   :  { %p342_p13 = scmp.ne.s32.totalorder %s453_s6, %s341_s21  ;;  %p345_p0 = scmp.lt.u32.totalorder %s341_s21, %s453_s6 }
 0x2da   :  { %p347_p1 = pnand %p345_p0, %p342_p13 }
 0x2dc   :  { %350 = shalt.err (!%p347_p1)
}
 0x2dd   :  { %256 = dma.vmem_to_hbm [thread:$0]  %s254_s17, 16, %s453_s6, [#allocation6]  }
 0x2de   :  { %353 = dma.done.wait [#allocation6], 16  }
 0x2df   :  { %354 = vsyncadd [#allocation6], 4294967280 }
 0x2e0   :  { %260 = vsyncpa [#allocation5], 1 }
 0x2e1   :  { %261 = vsyncpa [#allocation6], 1 }

</bundles_post_ra>
